<compile_context>
chip_gen: v7x
topology: tpu7x:2x2x1
jax: 0.10.0
libtpu: 0.0.40
codegen_flags: <defaults>
</compile_context>

<pallas_src>
import functools

import jax
import jax.numpy as jnp
from jax import lax
from jax.experimental import pallas as pl
from jax.experimental.pallas import tpu as pltpu

_LANES = 128
_CHUNK = 8          # sublanes per inner compute chunk -> one vreg per component
_MAX_R_TILE = 512   # sublanes per grid step -> 512*128 = 65536 boxes, ~2.75 MiB


def _probiou_sum_kernel(pred_ref, tgt_ref, wgt_ref, out_ref, acc_ref, *,
                        eps: float, mode: str, deform: bool,
                        n_steps: int, n_chunks: int):
    step = pl.program_id(1)

    @pl.when(step == 0)
    def _():
        acc_ref[...] = jnp.zeros_like(acc_ref)

    def chunk_body(j, carry):
        r0 = pl.multiple_of(j * _CHUNK, _CHUNK)
        sl = pl.ds(r0, _CHUNK)
        x1 = pred_ref[0, sl, :]
        y1 = pred_ref[1, sl, :]
        w1 = pred_ref[2, sl, :]
        h1 = pred_ref[3, sl, :]
        ang1 = pred_ref[4, sl, :]
        x2 = tgt_ref[0, sl, :]
        y2 = tgt_ref[1, sl, :]
        w2 = tgt_ref[2, sl, :]
        h2 = tgt_ref[3, sl, :]
        ang2 = tgt_ref[4, sl, :]
        wgt = wgt_ref[0, sl, :]

        # gbb_form: (x, y, w^2/12, h^2/12, angle)
        a1_ = w1 * w1 * (1.0 / 12.0)
        b1_ = h1 * h1 * (1.0 / 12.0)
        a2_ = w2 * w2 * (1.0 / 12.0)
        b2_ = h2 * h2 * (1.0 / 12.0)

        # rotated_form via double-angle identities:
        #   a = (a_+b_)/2 + (a_-b_)/2 * cos(2t)
        #   b = (a_+b_)/2 - (a_-b_)/2 * cos(2t)
        #   c = (a_-b_)/2 * sin(2t)
        c2a1 = jnp.cos(2.0 * ang1)
        s2a1 = jnp.sin(2.0 * ang1)
        c2a2 = jnp.cos(2.0 * ang2)
        s2a2 = jnp.sin(2.0 * ang2)
        hs1 = 0.5 * (a1_ + b1_)
        hd1 = 0.5 * (a1_ - b1_)
        hs2 = 0.5 * (a2_ + b2_)
        hd2 = 0.5 * (a2_ - b2_)
        a1 = hs1 + hd1 * c2a1
        b1 = hs1 - hd1 * c2a1
        c1 = hd1 * s2a1
        a2 = hs2 + hd2 * c2a2
        b2 = hs2 - hd2 * c2a2
        c2 = hd2 * s2a2

        sa_ab = a1 + a2
        sb_ab = b1 + b2
        sc_ab = c1 + c2
        dx = x1 - x2                 # (x2 - x1) == -dx
        dy = y1 - y2
        dx2 = dx * dx
        dy2 = dy * dy
        dxdy = dx * dy
        t2 = sa_ab * sb_ab - sc_ab * sc_ab
        det12 = (a1 * b1 - c1 * c1) * (a2 * b2 - c2 * c2)

        if deform:
            t1 = 0.25 * (sa_ab * dy2 + sb_ab * dx2) - 0.5 * (sc_ab * dxdy)
            # exact division inside the log argument (precision); approx
            # reciprocal only for the t1/t2 scaling.
            t3 = 0.5 * jnp.log(t2 / (4.0 * jnp.sqrt(jnp.maximum(det12, 0.0)) + eps))
            b_d = t1 * pl.reciprocal(t2, approx=True) + t3
        else:
            inv_den = pl.reciprocal(t2 + eps, approx=True)   # shared denominator
            t1 = (sa_ab * dy2 + sb_ab * dx2) * inv_den * 0.25
            t2b = -(sc_ab * dxdy) * inv_den * 0.5
            t3 = 0.5 * jnp.log(t2 / (4.0 * jnp.sqrt(det12) + eps) + eps)
            b_d = t1 + t2b + t3

        b_d = jnp.clip(b_d, eps, 100.0)
        if mode == 'l1':
            loss = jnp.sqrt(1.0 - jnp.exp(-b_d) + eps)
        else:  # 'l2': -log(1 - (1 - exp(-b_d) + eps) + eps) == b_d exactly
            loss = b_d

        return carry + loss * wgt

    part = lax.fori_loop(0, n_chunks, chunk_body,
                         jnp.zeros((_CHUNK, _LANES), jnp.float32))
    acc_ref[...] = acc_ref[...] + part          # one RMW of the scratch per step

    @pl.when(step == n_steps - 1)
    def _():
        # One-time sublane reduction; lane-dense (1, 128) partial-sum store.
        out_ref[...] = jnp.sum(acc_ref[...], axis=0, keepdims=True)


def probiou_loss_pallas(loc_p, loc_t, weight, avg_factor=None,
                        *, mode='l1', eps=1e-3, loss_weight=1.0, deform=True):
    """Equivalent of ProbiouLoss(mode, eps, loss_weight, deform).forward(...)."""
    if mode not in ('l1', 'l2'):
        raise ValueError(f"unsupported mode: {mode}")
    if avg_factor is None:
        avg_factor = 1.0
    n = loc_p.shape[0]

    # Adaptive block: big enough to amortize per-step overhead, small enough
    # not to over-pad tiny inputs; always a multiple of the 8-sublane chunk.
    needed_rows = pl.cdiv(max(n, 1), _LANES)
    r_tile = max(_CHUNK, min(_MAX_R_TILE, _CHUNK * pl.cdiv(needed_rows, _CHUNK)))
    boxes_per_step = r_tile * _LANES
    total_blocks = max(1, pl.cdiv(n, boxes_per_step))
    n_par = 2 if total_blocks >= 2 else 1     # split reduction across TCs (v7x)
    n_steps = pl.cdiv(total_blocks, n_par)
    total_blocks = n_par * n_steps
    n_pad = total_blocks * boxes_per_step
    pad = n_pad - n

    # SoA repack (three separate inputs, no big concat slab).  Padded boxes get
    # benign all-ones geometry (finite math); weight pads to 0, so padded lanes
    # contribute exactly zero without a mask input.
    # TODO(synk): accept component-major (5, N)/(N,) inputs from the producer to
    # drop the pad/transpose plumbing entirely on bandwidth-bound v5e/v6e.
    pred_soa = jnp.pad(loc_p.astype(jnp.float32).T, ((0, 0), (0, pad)),
                       constant_values=1.0).reshape(5, total_blocks * r_tile, _LANES)
    tgt_soa = jnp.pad(loc_t.astype(jnp.float32).T, ((0, 0), (0, pad)),
                      constant_values=1.0).reshape(5, total_blocks * r_tile, _LANES)
    wgt_soa = jnp.pad(weight.astype(jnp.float32).reshape(-1),
                      (0, pad)).reshape(1, total_blocks * r_tile, _LANES)

    kernel = functools.partial(_probiou_sum_kernel, eps=float(eps), mode=mode,
                               deform=deform, n_steps=n_steps,
                               n_chunks=r_tile // _CHUNK)

    def idx_map(s, i):
        return (0, s * n_steps + i, 0)

    partials = pl.pallas_call(
        kernel,
        out_shape=jax.ShapeDtypeStruct((1, n_par * _LANES), jnp.float32),
        grid_spec=pltpu.PrefetchScalarGridSpec(
            num_scalar_prefetch=0,
            grid=(n_par, n_steps),
            in_specs=[
                pl.BlockSpec((5, r_tile, _LANES), idx_map),
                pl.BlockSpec((5, r_tile, _LANES), idx_map),
                pl.BlockSpec((1, r_tile, _LANES), idx_map),
            ],
            out_specs=pl.BlockSpec((1, _LANES), lambda s, i: (0, s)),
            scratch_shapes=[pltpu.VMEM((_CHUNK, _LANES), jnp.float32)],
        ),
        compiler_params=pltpu.CompilerParams(
            dimension_semantics=("parallel", "arbitrary")),
    )(pred_soa, tgt_soa, wgt_soa)

    total = jnp.sum(partials)
    return (loss_weight * total / avg_factor)[None]   # shape (1,)


# ---------------- pure-JAX reference (for verification) ----------------
def _probiou_ref(pred, target, weight, avg_factor=None,
                 mode='l1', eps=1e-3, loss_weight=1.0, deform=True):
    if avg_factor is None:
        avg_factor = 1.0
    pred = pred.astype(jnp.float32)
    target = target.astype(jnp.float32)
    x1, y1 = pred[:, 0], pred[:, 1]
    a1_, b1_, ang1 = pred[:, 2] ** 2 / 12.0, pred[:, 3] ** 2 / 12.0, pred[:, 4]
    x2, y2 = target[:, 0], target[:, 1]
    a2_, b2_, ang2 = target[:, 2] ** 2 / 12.0, target[:, 3] ** 2 / 12.0, target[:, 4]

    def rot(a_, b_, ang):
        ca, sa = jnp.cos(ang), jnp.sin(ang)
        return (a_ * ca ** 2 + b_ * sa ** 2,
                a_ * sa ** 2 + b_ * ca ** 2,
                (a_ - b_) * ca * sa)

    a1, b1, c1 = rot(a1_, b1_, ang1)
    a2, b2, c2 = rot(a2_, b2_, ang2)
    if deform:
        t1 = 0.25 * ((a1 + a2) * (y1 - y2) ** 2 + (b1 + b2) * (x1 - x2) ** 2) \
            + 0.5 * ((c1 + c2) * (x2 - x1) * (y1 - y2))
        t2 = (a1 + a2) * (b1 + b2) - (c1 + c2) ** 2
        t3_ = (a1 * b1 - c1 * c1) * (a2 * b2 - c2 * c2)
        t3 = 0.5 * jnp.log(t2 / (4.0 * jnp.sqrt(jnp.maximum(t3_, 0.0)) + eps))
        b_d = t1 / t2 + t3
    else:
        den = (a1 + a2) * (b1 + b2) - (c1 + c2) ** 2 + eps
        t1 = ((a1 + a2) * (y1 - y2) ** 2 + (b1 + b2) * (x1 - x2) ** 2) / den * 0.25
        t2t = (c1 + c2) * (x2 - x1) * (y1 - y2) / den * 0.5
        t3 = jnp.log(((a1 + a2) * (b1 + b2) - (c1 + c2) ** 2)
                     / (4.0 * jnp.sqrt((a1 * b1 - c1 * c1) * (a2 * b2 - c2 * c2)) + eps)
                     + eps) * 0.5
        b_d = t1 + t2t + t3
    b_d = jnp.clip(b_d, eps, 100.0)
    l1 = jnp.sqrt(1.0 - jnp.exp(-b_d) + eps)
    loss = l1 if mode == 'l1' else -jnp.log(1.0 - l1 ** 2 + eps)
    return (loss_weight * jnp.sum(loss * weight) / avg_factor)[None]


if __name__ == "__main__":
    base_key = jax.random.PRNGKey(0)

    def make_inputs(n, tag):
        key = jax.random.fold_in(base_key, tag)
        k1, k2, k3, k4, k5, k6 = jax.random.split(key, 6)
        xy_p = jax.random.uniform(k1, (n, 2), jnp.float32, 0.0, 64.0)
        wh_p = jax.random.uniform(k2, (n, 2), jnp.float32, 4.0, 32.0)
        ang_p = jax.random.uniform(k3, (n, 1), jnp.float32, -1.5, 1.5)
        loc_p = jnp.concatenate([xy_p, wh_p, ang_p], axis=1)             # [N, 5]
        xy_t = xy_p + jax.random.normal(k4, (n, 2)) * 2.0
        wh_t = wh_p * (1.0 + 0.1 * jax.random.normal(k5, (n, 2)))
        ang_t = ang_p + 0.1
        loc_t = jnp.concatenate([xy_t, wh_t, ang_t], axis=1)             # [N, 5]
        weight = jax.random.uniform(k6, (n,), jnp.float32)
        return loc_p, loc_t, weight

    checks = [
        dict(n=37, mode='l1', deform=True),
        dict(n=37, mode='l2', deform=True),
        dict(n=37, mode='l1', deform=False),
        dict(n=10000, mode='l1', deform=True),    # single big block, inner loop
        dict(n=150000, mode='l1', deform=True),   # multi-step + 2-way TC split
    ]
    for idx, cfg in enumerate(checks):
        loc_p, loc_t, weight = make_inputs(cfg['n'], idx)
        avg_factor = float(cfg['n'])
        out = probiou_loss_pallas(loc_p, loc_t, weight, avg_factor,
                                  mode=cfg['mode'], eps=1e-3, loss_weight=1.0,
                                  deform=cfg['deform'])
        out = jax.block_until_ready(out)
        ref = _probiou_ref(loc_p, loc_t, weight, avg_factor,
                           mode=cfg['mode'], eps=1e-3, loss_weight=1.0,
                           deform=cfg['deform'])
        assert out.shape == (1,)
        # tolerance relaxed slightly: in-kernel 1/t2 uses the EUP approx
        # reciprocal and rotated_form uses double-angle identities
        assert jnp.allclose(out, ref, rtol=5e-3, atol=5e-4), (cfg, out, ref)
    print("KERNEL_OK")
</pallas_src>

<mosaic_0001>
module attributes {stable_mosaic.version = 11 : i64} {
  func.func @_probiou_sum_kernel(%arg0: i32, %arg1: i32, %arg2: memref<5x8x128xf32, #tpu.memory_space<vmem>>, %arg3: memref<5x8x128xf32, #tpu.memory_space<vmem>>, %arg4: memref<1x8x128xf32, #tpu.memory_space<vmem>>, %arg5: memref<1x128xf32, #tpu.memory_space<vmem>>, %arg6: memref<8x128xf32, #tpu.memory_space<vmem>>) attributes {dimension_semantics = [#tpu.dimension_semantics<parallel>, #tpu.dimension_semantics<arbitrary>], iteration_bounds = array<i64: 1, 1>, scalar_prefetch = 0 : i64, scratch_operands = 1 : i64, tpu.core_type = #tpu.core_type<tc>, window_params = [{transform_indices = @transform_0, window_bounds = array<i64: 5, 8, 128>}, {transform_indices = @transform_1, window_bounds = array<i64: 5, 8, 128>}, {transform_indices = @transform_2, window_bounds = array<i64: 1, 8, 128>}, {transform_indices = @transform_3, window_bounds = array<i64: 1, 128>}]} {
    %c0_i32 = arith.constant 0 : i32
    %0 = arith.cmpi eq, %arg1, %c0_i32 : i32
    %1 = arith.extui %0 : i1 to i32
    %c0_i32_0 = arith.constant 0 : i32
    %2 = arith.cmpi ne, %1, %c0_i32_0 : i32
    scf.if %2 {
      %cst_48 = arith.constant 0.000000e+00 : f32
      %146 = vector.broadcast %cst_48 : f32 to vector<8x128xf32>
      %c0_49 = arith.constant 0 : index
      %c0_50 = arith.constant 0 : index
      %147 = vector.load %arg6[%c0_49, %c0_50] : memref<8x128xf32, #tpu.memory_space<vmem>>, vector<8x128xf32>
      tpu.vector_store %arg6[%c0_49, %c0_50], %146 {strides = array<i32>} : memref<8x128xf32, #tpu.memory_space<vmem>>, vector<8x128xf32>,
    } else {
    }
    %cst = arith.constant 0.000000e+00 : f32
    %3 = vector.broadcast %cst : f32 to vector<8x128xf32>
    %c0_i32_1 = arith.constant 0 : i32
    %c8_i32 = arith.constant 8 : i32
    %4 = arith.muli %c0_i32_1, %c8_i32 : i32
    %5 = tpu.assume_multiple %4, 8 : i32
    %c0 = arith.constant 0 : index
    %6 = arith.index_cast %5 : i32 to index
    %c0_2 = arith.constant 0 : index
    %7 = vector.load %arg2[%c0, %6, %c0_2] : memref<5x8x128xf32, #tpu.memory_space<vmem>>, vector<1x8x128xf32>
    %8 = vector.shape_cast %7 : vector<1x8x128xf32> to vector<8x128xf32>
    %c1 = arith.constant 1 : index
    %9 = arith.index_cast %5 : i32 to index
    %c0_3 = arith.constant 0 : index
    %10 = vector.load %arg2[%c1, %9, %c0_3] : memref<5x8x128xf32, #tpu.memory_space<vmem>>, vector<1x8x128xf32>
    %11 = vector.shape_cast %10 : vector<1x8x128xf32> to vector<8x128xf32>
    %c2 = arith.constant 2 : index
    %12 = arith.index_cast %5 : i32 to index
    %c0_4 = arith.constant 0 : index
    %13 = vector.load %arg2[%c2, %12, %c0_4] : memref<5x8x128xf32, #tpu.memory_space<vmem>>, vector<1x8x128xf32>
    %14 = vector.shape_cast %13 : vector<1x8x128xf32> to vector<8x128xf32>
    %c3 = arith.constant 3 : index
    %15 = arith.index_cast %5 : i32 to index
    %c0_5 = arith.constant 0 : index
    %16 = vector.load %arg2[%c3, %15, %c0_5] : memref<5x8x128xf32, #tpu.memory_space<vmem>>, vector<1x8x128xf32>
    %17 = vector.shape_cast %16 : vector<1x8x128xf32> to vector<8x128xf32>
    %c4 = arith.constant 4 : index
    %18 = arith.index_cast %5 : i32 to index
    %c0_6 = arith.constant 0 : index
    %19 = vector.load %arg2[%c4, %18, %c0_6] : memref<5x8x128xf32, #tpu.memory_space<vmem>>, vector<1x8x128xf32>
    %20 = vector.shape_cast %19 : vector<1x8x128xf32> to vector<8x128xf32>
    %c0_7 = arith.constant 0 : index
    %21 = arith.index_cast %5 : i32 to index
    %c0_8 = arith.constant 0 : index
    %22 = vector.load %arg3[%c0_7, %21, %c0_8] : memref<5x8x128xf32, #tpu.memory_space<vmem>>, vector<1x8x128xf32>
    %23 = vector.shape_cast %22 : vector<1x8x128xf32> to vector<8x128xf32>
    %c1_9 = arith.constant 1 : index
    %24 = arith.index_cast %5 : i32 to index
    %c0_10 = arith.constant 0 : index
    %25 = vector.load %arg3[%c1_9, %24, %c0_10] : memref<5x8x128xf32, #tpu.memory_space<vmem>>, vector<1x8x128xf32>
    %26 = vector.shape_cast %25 : vector<1x8x128xf32> to vector<8x128xf32>
    %c2_11 = arith.constant 2 : index
    %27 = arith.index_cast %5 : i32 to index
    %c0_12 = arith.constant 0 : index
    %28 = vector.load %arg3[%c2_11, %27, %c0_12] : memref<5x8x128xf32, #tpu.memory_space<vmem>>, vector<1x8x128xf32>
    %29 = vector.shape_cast %28 : vector<1x8x128xf32> to vector<8x128xf32>
    %c3_13 = arith.constant 3 : index
    %30 = arith.index_cast %5 : i32 to index
    %c0_14 = arith.constant 0 : index
    %31 = vector.load %arg3[%c3_13, %30, %c0_14] : memref<5x8x128xf32, #tpu.memory_space<vmem>>, vector<1x8x128xf32>
    %32 = vector.shape_cast %31 : vector<1x8x128xf32> to vector<8x128xf32>
    %c4_15 = arith.constant 4 : index
    %33 = arith.index_cast %5 : i32 to index
    %c0_16 = arith.constant 0 : index
    %34 = vector.load %arg3[%c4_15, %33, %c0_16] : memref<5x8x128xf32, #tpu.memory_space<vmem>>, vector<1x8x128xf32>
    %35 = vector.shape_cast %34 : vector<1x8x128xf32> to vector<8x128xf32>
    %c0_17 = arith.constant 0 : index
    %36 = arith.index_cast %5 : i32 to index
    %c0_18 = arith.constant 0 : index
    %37 = vector.load %arg4[%c0_17, %36, %c0_18] : memref<1x8x128xf32, #tpu.memory_space<vmem>>, vector<1x8x128xf32>
    %38 = vector.shape_cast %37 : vector<1x8x128xf32> to vector<8x128xf32>
    %39 = arith.mulf %14, %14 : vector<8x128xf32>
    %cst_19 = arith.constant 0.0833333358 : f32
    %40 = vector.broadcast %cst_19 : f32 to vector<8x128xf32>
    %41 = arith.mulf %39, %40 : vector<8x128xf32>
    %42 = arith.mulf %17, %17 : vector<8x128xf32>
    %cst_20 = arith.constant 0.0833333358 : f32
    %43 = vector.broadcast %cst_20 : f32 to vector<8x128xf32>
    %44 = arith.mulf %42, %43 : vector<8x128xf32>
    %45 = arith.mulf %29, %29 : vector<8x128xf32>
    %cst_21 = arith.constant 0.0833333358 : f32
    %46 = vector.broadcast %cst_21 : f32 to vector<8x128xf32>
    %47 = arith.mulf %45, %46 : vector<8x128xf32>
    %48 = arith.mulf %32, %32 : vector<8x128xf32>
    %cst_22 = arith.constant 0.0833333358 : f32
    %49 = vector.broadcast %cst_22 : f32 to vector<8x128xf32>
    %50 = arith.mulf %48, %49 : vector<8x128xf32>
    %cst_23 = arith.constant 2.000000e+00 : f32
    %51 = vector.broadcast %cst_23 : f32 to vector<8x128xf32>
    %52 = arith.mulf %51, %20 : vector<8x128xf32>
    %53 = math.cos %52 : vector<8x128xf32>
    %cst_24 = arith.constant 2.000000e+00 : f32
    %54 = vector.broadcast %cst_24 : f32 to vector<8x128xf32>
    %55 = arith.mulf %54, %20 : vector<8x128xf32>
    %56 = math.sin %55 : vector<8x128xf32>
    %cst_25 = arith.constant 2.000000e+00 : f32
    %57 = vector.broadcast %cst_25 : f32 to vector<8x128xf32>
    %58 = arith.mulf %57, %35 : vector<8x128xf32>
    %59 = math.cos %58 : vector<8x128xf32>
    %cst_26 = arith.constant 2.000000e+00 : f32
    %60 = vector.broadcast %cst_26 : f32 to vector<8x128xf32>
    %61 = arith.mulf %60, %35 : vector<8x128xf32>
    %62 = math.sin %61 : vector<8x128xf32>
    %63 = arith.addf %41, %44 : vector<8x128xf32>
    %cst_27 = arith.constant 5.000000e-01 : f32
    %64 = vector.broadcast %cst_27 : f32 to vector<8x128xf32>
    %65 = arith.mulf %64, %63 : vector<8x128xf32>
    %66 = arith.subf %41, %44 : vector<8x128xf32>
    %cst_28 = arith.constant 5.000000e-01 : f32
    %67 = vector.broadcast %cst_28 : f32 to vector<8x128xf32>
    %68 = arith.mulf %67, %66 : vector<8x128xf32>
    %69 = arith.addf %47, %50 : vector<8x128xf32>
    %cst_29 = arith.constant 5.000000e-01 : f32
    %70 = vector.broadcast %cst_29 : f32 to vector<8x128xf32>
    %71 = arith.mulf %70, %69 : vector<8x128xf32>
    %72 = arith.subf %47, %50 : vector<8x128xf32>
    %cst_30 = arith.constant 5.000000e-01 : f32
    %73 = vector.broadcast %cst_30 : f32 to vector<8x128xf32>
    %74 = arith.mulf %73, %72 : vector<8x128xf32>
    %75 = arith.mulf %68, %53 : vector<8x128xf32>
    %76 = arith.addf %65, %75 : vector<8x128xf32>
    %77 = arith.mulf %68, %53 : vector<8x128xf32>
    %78 = arith.subf %65, %77 : vector<8x128xf32>
    %79 = arith.mulf %68, %56 : vector<8x128xf32>
    %80 = arith.mulf %74, %59 : vector<8x128xf32>
    %81 = arith.addf %71, %80 : vector<8x128xf32>
    %82 = arith.mulf %74, %59 : vector<8x128xf32>
    %83 = arith.subf %71, %82 : vector<8x128xf32>
    %84 = arith.mulf %74, %62 : vector<8x128xf32>
    %85 = arith.addf %76, %81 : vector<8x128xf32>
    %86 = arith.addf %78, %83 : vector<8x128xf32>
    %87 = arith.addf %79, %84 : vector<8x128xf32>
    %88 = arith.subf %8, %23 : vector<8x128xf32>
    %89 = arith.subf %11, %26 : vector<8x128xf32>
    %90 = arith.mulf %88, %88 : vector<8x128xf32>
    %91 = arith.mulf %89, %89 : vector<8x128xf32>
    %92 = arith.mulf %88, %89 : vector<8x128xf32>
    %93 = arith.mulf %85, %86 : vector<8x128xf32>
    %94 = arith.mulf %87, %87 : vector<8x128xf32>
    %95 = arith.subf %93, %94 : vector<8x128xf32>
    %96 = arith.mulf %76, %78 : vector<8x128xf32>
    %97 = arith.mulf %79, %79 : vector<8x128xf32>
    %98 = arith.subf %96, %97 : vector<8x128xf32>
    %99 = arith.mulf %81, %83 : vector<8x128xf32>
    %100 = arith.mulf %84, %84 : vector<8x128xf32>
    %101 = arith.subf %99, %100 : vector<8x128xf32>
    %102 = arith.mulf %98, %101 : vector<8x128xf32>
    %103 = arith.mulf %85, %91 : vector<8x128xf32>
    %104 = arith.mulf %86, %90 : vector<8x128xf32>
    %105 = arith.addf %103, %104 : vector<8x128xf32>
    %cst_31 = arith.constant 2.500000e-01 : f32
    %106 = vector.broadcast %cst_31 : f32 to vector<8x128xf32>
    %107 = arith.mulf %106, %105 : vector<8x128xf32>
    %108 = arith.mulf %87, %92 : vector<8x128xf32>
    %cst_32 = arith.constant 5.000000e-01 : f32
    %109 = vector.broadcast %cst_32 : f32 to vector<8x128xf32>
    %110 = arith.mulf %109, %108 : vector<8x128xf32>
    %111 = arith.subf %107, %110 : vector<8x128xf32>
    %cst_33 = arith.constant 0.000000e+00 : f32
    %112 = vector.broadcast %cst_33 : f32 to vector<8x128xf32>
    %113 = arith.maximumf %102, %112 : vector<8x128xf32>
    %114 = math.sqrt %113 : vector<8x128xf32>
    %cst_34 = arith.constant 4.000000e+00 : f32
    %115 = vector.broadcast %cst_34 : f32 to vector<8x128xf32>
    %116 = arith.mulf %115, %114 : vector<8x128xf32>
    %cst_35 = arith.constant 1.000000e-03 : f32
    %117 = vector.broadcast %cst_35 : f32 to vector<8x128xf32>
    %118 = arith.addf %116, %117 : vector<8x128xf32>
    %119 = arith.divf %95, %118 : vector<8x128xf32>
    %120 = math.log %119 : vector<8x128xf32>
    %cst_36 = arith.constant 5.000000e-01 : f32
    %121 = vector.broadcast %cst_36 : f32 to vector<8x128xf32>
    %122 = arith.mulf %121, %120 : vector<8x128xf32>
    %123 = tpu.reciprocal %95 {approx = true} : vector<8x128xf32> -> vector<8x128xf32>
    %124 = arith.mulf %111, %123 : vector<8x128xf32>
    %125 = arith.addf %124, %122 : vector<8x128xf32>
    %cst_37 = arith.constant 1.000000e-03 : f32
    %cst_38 = arith.constant 1.000000e+02 : f32
    %126 = vector.broadcast %cst_37 : f32 to vector<8x128xf32>
    %127 = arith.maximumf %126, %125 : vector<8x128xf32>
    %128 = vector.broadcast %cst_38 : f32 to vector<8x128xf32>
    %129 = arith.minimumf %128, %127 : vector<8x128xf32>
    %cst_39 = arith.constant 0.000000e+00 : f32
    %130 = vector.broadcast %cst_39 : f32 to vector<8x128xf32>
    %131 = arith.subf %130, %129 : vector<8x128xf32>
    %132 = math.exp %131 : vector<8x128xf32>
    %cst_40 = arith.constant 1.000000e+00 : f32
    %133 = vector.broadcast %cst_40 : f32 to vector<8x128xf32>
    %134 = arith.subf %133, %132 : vector<8x128xf32>
    %cst_41 = arith.constant 1.000000e-03 : f32
    %135 = vector.broadcast %cst_41 : f32 to vector<8x128xf32>
    %136 = arith.addf %134, %135 : vector<8x128xf32>
    %137 = math.sqrt %136 : vector<8x128xf32>
    %138 = arith.mulf %137, %38 : vector<8x128xf32>
    %139 = arith.addf %3, %138 : vector<8x128xf32>
    %c1_i32 = arith.constant 1 : i32
    %c0_42 = arith.constant 0 : index
    %c0_43 = arith.constant 0 : index
    %140 = vector.load %arg6[%c0_42, %c0_43] : memref<8x128xf32, #tpu.memory_space<vmem>>, vector<8x128xf32>
    %141 = arith.addf %140, %139 : vector<8x128xf32>
    %c0_44 = arith.constant 0 : index
    %c0_45 = arith.constant 0 : index
    %142 = vector.load %arg6[%c0_44, %c0_45] : memref<8x128xf32, #tpu.memory_space<vmem>>, vector<8x128xf32>
    tpu.vector_store %arg6[%c0_44, %c0_45], %141 {strides = array<i32>} : memref<8x128xf32, #tpu.memory_space<vmem>>, vector<8x128xf32>,
    %c0_i32_46 = arith.constant 0 : i32
    %143 = arith.cmpi eq, %arg1, %c0_i32_46 : i32
    %144 = arith.extui %143 : i1 to i32
    %c0_i32_47 = arith.constant 0 : i32
    %145 = arith.cmpi ne, %144, %c0_i32_47 : i32
    scf.if %145 {
      %c0_48 = arith.constant 0 : index
      %c0_49 = arith.constant 0 : index
      %146 = vector.load %arg6[%c0_48, %c0_49] : memref<8x128xf32, #tpu.memory_space<vmem>>, vector<8x128xf32>
      %cst_50 = arith.constant dense<0.000000e+00> : vector<128xf32>
      %147 = vector.multi_reduction <add>, %146, %cst_50 [0] : vector<8x128xf32> to vector<128xf32>
      %148 = vector.shape_cast %147 : vector<128xf32> to vector<1x128xf32>
      %c0_51 = arith.constant 0 : index
      %c0_52 = arith.constant 0 : index
      %149 = vector.load %arg5[%c0_51, %c0_52] : memref<1x128xf32, #tpu.memory_space<vmem>>, vector<1x128xf32>
      tpu.vector_store %arg5[%c0_51, %c0_52], %148 {strides = array<i32>} : memref<1x128xf32, #tpu.memory_space<vmem>>, vector<1x128xf32>,
    } else {
    }
    return
  }
  func.func @transform_0(%arg0: i32, %arg1: i32) -> (i32, i32, i32) {
    %c1_i32 = arith.constant 1 : i32
    %0 = arith.muli %arg0, %c1_i32 : i32
    %1 = arith.addi %0, %arg1 : i32
    %c0_i32 = arith.constant 0 : i32
    %c0_i32_0 = arith.constant 0 : i32
    %c0_i32_1 = arith.constant 0 : i32
    return %c0_i32, %1, %c0_i32_0 : i32, i32, i32
  }
  func.func @transform_1(%arg0: i32, %arg1: i32) -> (i32, i32, i32) {
    %c1_i32 = arith.constant 1 : i32
    %0 = arith.muli %arg0, %c1_i32 : i32
    %1 = arith.addi %0, %arg1 : i32
    %c0_i32 = arith.constant 0 : i32
    %c0_i32_0 = arith.constant 0 : i32
    %c0_i32_1 = arith.constant 0 : i32
    return %c0_i32, %1, %c0_i32_0 : i32, i32, i32
  }
  func.func @transform_2(%arg0: i32, %arg1: i32) -> (i32, i32, i32) {
    %c1_i32 = arith.constant 1 : i32
    %0 = arith.muli %arg0, %c1_i32 : i32
    %1 = arith.addi %0, %arg1 : i32
    %c0_i32 = arith.constant 0 : i32
    %c0_i32_0 = arith.constant 0 : i32
    %c0_i32_1 = arith.constant 0 : i32
    return %c0_i32, %1, %c0_i32_0 : i32, i32, i32
  }
  func.func @transform_3(%arg0: i32, %arg1: i32) -> (i32, i32) {
    %c0_i32 = arith.constant 0 : i32
    %c0_i32_0 = arith.constant 0 : i32
    return %c0_i32, %arg0 : i32, i32
  }
}

</mosaic_0001>

<bundles_post_ra>
// kernel: tpu_custom_call.1
= control target key start
LH: loop header
LB: loop body
LE: loop exit
PB: predicated region body
PF: predicated region fallthrough
CT: control target
= control target key end

     0   :  { %8 = vsyncpa [#allocation4], 0  ;;  %s941_s0 = inlined_call_operand.hbm [shape: f32[5,8,128], index: 0, kind: input, shape index: {}]   ;;  %s942_s1 = inlined_call_operand.hbm [shape: f32[5,8,128], index: 1, kind: input, shape index: {}]   ;;  %s943_s2 = inlined_call_operand.hbm [shape: f32[1,8,128], index: 2, kind: input, shape index: {}]   ;;  %s944_s3 = inlined_call_operand.hbm [shape: f32[1,128], index: 3, kind: output, shape index: {}]  }
   0x1   :  { %9 = vsyncpa [#allocation7], 0 }
   0x2   :  { %10 = vsyncpa [#allocation5], 0  ;;  %s781_s12 = smov [#allocation6]   ;;  %s782_s14 = smov [#allocation3]  }
   0x3   :  { %s34_s13 = sshll.u32 %s781_s12, 4  ;;  %s19_s15 = sshll.u32 %s782_s14, 4  ;;  %s35_s13 = int_to_ptr.vmem [resolvable:$true] %s34_s13  ;;  %s813_s15 = int_to_ptr.vmem [resolvable:$true] %s19_s15 }
   0x4   :  { %s687_s18 = scalar_lea.hbm %s942_s1, 640 }
   0x5   :  { %p688_p0 = scmp.ne.s32.totalorder %s942_s1, %s687_s18  ;;  %p691_p1 = scmp.lt.u32.totalorder %s687_s18, %s942_s1 }
   0x7   :  { %p693_p2 = pnand %p691_p1, %p688_p0 }
   0x9   :  { %696 = shalt.err (!%p693_p2)
}
   0xa   :  { %s697_s23 = scalar_lea.vmem %s35_s13, 640  ;;  %p702_p4 = scmp.lt.s32.totalorder %s35_s13, %s35_s13 }
   0xb   :  { %p698_p3 = scmp.ne.s32.totalorder %s35_s13, %s697_s23  ;;  %p703_p5 = scmp.lt.s32.totalorder %s697_s23, %s697_s23 }
   0xd   :  { %p704_p6 = por %p703_p5, %p702_p4 }
   0xf   :  { %p705_p7 = pnand %p704_p6, %p698_p3 }
  0x11   :  { %708 = shalt.err (!%p705_p7)
}
  0x12   :  { %s783_s24 = smov 128   ;;  %s784_s25 = smov 8  }
  0x13   :  { %40 = dma.hbm_to_vmem [thread:$0]  %s942_s1, 640, %s35_s13, [#allocation7], %s783_s24, %s783_s24, %s784_s25  }
  0x14   :  { %s709_s30 = scalar_lea.hbm %s941_s0, 640 }
  0x15   :  { %p710_p8 = scmp.ne.s32.totalorder %s941_s0, %s709_s30  ;;  %p713_p9 = scmp.lt.u32.totalorder %s709_s30, %s941_s0 }
  0x17   :  { %p715_p10 = pnand %p713_p9, %p710_p8 }
  0x19   :  { %718 = shalt.err (!%p715_p10)
}
  0x1a   :  { %s719_s8 = scalar_lea.vmem %s813_s15, 640  ;;  %p724_p12 = scmp.lt.s32.totalorder %s813_s15, %s813_s15 }
  0x1b   :  { %p720_p11 = scmp.ne.s32.totalorder %s813_s15, %s719_s8  ;;  %p725_p13 = scmp.lt.s32.totalorder %s719_s8, %s719_s8 }
  0x1d   :  { %p726_p0 = por %p725_p13, %p724_p12 }
  0x1f   :  { %p727_p1 = pnand %p726_p0, %p720_p11 }
  0x21   :  { %730 = shalt.err (!%p727_p1)
}
  0x22   :  { %25 = dma.hbm_to_vmem [thread:$0]  %s941_s0, 640, %s813_s15, [#allocation4], %s783_s24, %s783_s24, %s784_s25  }
  0x23   :  { %s785_s10 = smov [#allocation8]   ;;  %s731_s14 = scalar_lea.hbm %s943_s2, 128 }
  0x24   :  { %s50_s11 = sshll.u32 %s785_s10, 4  ;;  %p732_p2 = scmp.ne.s32.totalorder %s943_s2, %s731_s14  ;;  %s51_s11 = int_to_ptr.vmem [resolvable:$true] %s50_s11 }
  0x25   :  { %p735_p3 = scmp.lt.u32.totalorder %s731_s14, %s943_s2 }
  0x27   :  { %p737_p4 = pnand %p735_p3, %p732_p2 }
  0x29   :  { %740 = shalt.err (!%p737_p4)
}
  0x2a   :  { %s741_s20 = scalar_lea.vmem %s51_s11, 128  ;;  %p746_p6 = scmp.lt.s32.totalorder %s51_s11, %s51_s11 }
  0x2b   :  { %p742_p5 = scmp.ne.s32.totalorder %s51_s11, %s741_s20  ;;  %p747_p7 = scmp.lt.s32.totalorder %s741_s20, %s741_s20 }
  0x2d   :  { %p748_p8 = por %p747_p7, %p746_p6 }
  0x2f   :  { %p749_p9 = pnand %p748_p8, %p742_p5 }
  0x31   :  { %752 = shalt.err (!%p749_p9)
}
  0x32   :  { %53 = dma.hbm_to_vmem [thread:$0]  %s943_s2, 128, %s51_s11, [#allocation7]  }
  0x33   :  { %775 = dma.done.wait [#allocation4], 640  }
  0x34   :  { %776 = vsyncadd [#allocation4], 4294966656 }
  0x35   :  { %777 = dma.done.wait [#allocation7], 768  }
  0x36   :  { %778 = vsyncadd [#allocation7], 4294966528  ;;  %v83_v0 = vld [vmem:[#allocation3 + $0x20] sm:$0xff]  ;;  %v92_v2 = vld [vmem:[#allocation6 + $0x20] sm:$0xff]  ;;  %v786_v23 = vmov 683565275  }
  0x37   :  { %v856_v1 = vmul.f32 2.0, %v83_v0  ;;  %v860_v5 = vmul.f32 2.0, %v92_v2  ;;  %v787_v25 = vmov 2475754826   ;;  %v788_v27 = vmov 2131351028  }
  0x38   :  { %v789_v29 = vmov 2102212464   ;;  %v790_v31 = vmov 920167782   ;;  %v791_v38 = vmov 1326507024  }
  0x39   :  { %v103_v3 = vand.u32 2147483647, %v856_v1  ;;  %v106_v4 = vand.u32 2139095040, %v856_v1  ;;  %v311_v8 = vand.u32 2147483647, %v860_v5  ;;  %v314_v9 = vand.u32 2139095040, %v860_v5 }
  0x3a   :  { %vm105_vm14 = vcmp.lt.s32.totalorder %v856_v1, 0  ;;  %s792_s2 = smov [#allocation9]  }
  0x3b   :  { %v107_v6 = vshrl.u32 %v106_v4, 23  ;;  %v110_v7 = vand.u32 8388607, %v103_v3  ;;  %v315_v11 = vshrl.u32 %v314_v9, 23  ;;  %v868_v15 = vand.u32 8388607, %v311_v8 }
  0x3c   :  { %vm104_vm15 = vcmp.le.f32.partialorder %v103_v3, 0.7853982  ;;  %s613_s21 = sshll.u32 %s792_s2, 4  ;;  %s614_s21 = int_to_ptr.vmem [resolvable:$true] %s613_s21 }
  0x3d   :  { %v631_v10 = vadd.s32 4294967169, %v107_v6  ;;  %v111_v13 = vor.u32 8388608, %v110_v7  ;;  %v639_v14 = vadd.s32 4294967169, %v315_v11  ;;  %v319_v21 = vor.u32 8388608, %v868_v15  ;;  %s753_s22 = scalar_lea.vmem %s614_s21, 16  ;;  %s757_s23 = scalar_lea.vmem %s614_s21, 32 }
  0x3e   :  { %p754_p10 = scmp.ne.s32.totalorder %s614_s21, %s753_s22  ;;  %p758_p11 = scmp.lt.s32.totalorder %s614_s21, %s614_s21 }
  0x3f   :  { %v113_v12 = vadd.s32 1, %v631_v10  ;;  %v321_v17 = vadd.s32 1, %v639_v14  ;;  %v870_v20 = vshll.u32 %v111_v13, 8  ;;  %p759_p12 = scmp.lt.s32.totalorder %s757_s23, %s753_s22 }
  0x41   :  { %vm114_vm0 = vcmp.gt.s32.totalorder %v113_v12, 0  ;;  %vm322_vm1 = vcmp.gt.s32.totalorder %v321_v17, 0  ;;  %p760_p13 = por %p759_p12, %p758_p11 }
  0x42   :  { %v115_v16 = vsel %vm114_vm0, %v113_v12, 0  ;;  %v323_v43 = vsel %vm322_vm1, %v321_v17, 0  ;;  %vm313_vm0 = vcmp.lt.s32.totalorder %v860_v5, 0  ;;  %vm312_vm1 = vcmp.le.f32.partialorder %v311_v8, 0.7853982 }
  0x43   :  { %v116_v18 = vshrl.u32 %v115_v16, 5  ;;  %v117_v19 = vand.u32 31, %v115_v16  ;;  %v324_v46 = vshrl.u32 %v323_v43, 5  ;;  %v325_v47 = vand.u32 31, %v323_v43  ;;  %p761_p0 = pnand %p760_p13, %p754_p10 }
  0x45   :  { %v118_v22 = vsub.s32 32, %v117_v19  ;;  %v120_v24 = vshll.u32 %v786_v23, %v117_v19  ;;  %v123_v26 = vshll.u32 %v787_v25, %v117_v19  ;;  %v126_v28 = vshll.u32 %v788_v27, %v117_v19 }
  0x46   :  { %v129_v30 = vshll.u32 %v789_v29, %v117_v19  ;;  %v132_v32 = vshll.u32 %v790_v31, %v117_v19  ;;  %vm135_vm2 = vcmp.lt.s32.totalorder %v116_v18, 1  ;;  %vm136_vm3 = vcmp.lt.s32.totalorder %v116_v18, 2 }
  0x47   :  { %v119_v33 = vshrl.u32 %v786_v23, %v118_v22  ;;  %v121_v34 = vshrl.u32 %v787_v25, %v118_v22  ;;  %v124_v35 = vshrl.u32 %v788_v27, %v118_v22  ;;  %v127_v36 = vshrl.u32 %v789_v29, %v118_v22 }
  0x48   :  { %v130_v37 = vshrl.u32 %v790_v31, %v118_v22  ;;  %v133_v39 = vshrl.u32 %v791_v38, %v118_v22  ;;  %vm137_vm4 = vcmp.lt.s32.totalorder %v116_v18, 3  ;;  %vm138_vm5 = vcmp.lt.s32.totalorder %v116_v18, 4 }
  0x49   :  { %v122_v40 = vor.u32 %v121_v34, %v120_v24  ;;  %v125_v41 = vor.u32 %v124_v35, %v123_v26  ;;  %v128_v42 = vor.u32 %v127_v36, %v126_v28  ;;  %v326_v55 = vsub.s32 32, %v325_v47 }
  0x4a   :  { %v131_v44 = vor.u32 %v130_v37, %v129_v30  ;;  %v134_v45 = vor.u32 %v133_v39, %v132_v32  ;;  %v328_v59 = vshll.u32 %v786_v23, %v325_v47  ;;  %v331_v9 = vshll.u32 %v787_v25, %v325_v47 }
  0x4b   :  { %v139_v48 = vsel %vm135_vm2, %v119_v33, %v122_v40  ;;  %v140_v49 = vsel %vm138_vm5, %v128_v42, 2102212464  ;;  %v143_v50 = vsel %vm135_vm2, %v122_v40, %v125_v41  ;;  %v147_v51 = vsel %vm135_vm2, %v125_v41, %v128_v42 }
  0x4c   :  { %v141_v52 = vsel %vm137_vm4, %v125_v41, %v140_v49  ;;  %v144_v53 = vsel %vm138_vm5, %v131_v44, 920167782  ;;  %v148_v54 = vsel %vm138_vm5, %v134_v45, 1326507024  ;;  %v327_v63 = vshrl.u32 %v786_v23, %v326_v55 }
  0x4d   :  { %v142_v56 = vsel %vm136_vm3, %v139_v48, %v141_v52  ;;  %v145_v57 = vsel %vm137_vm4, %v128_v42, %v144_v53  ;;  %v149_v58 = vsel %vm137_vm4, %v131_v44, %v148_v54  ;;  %v329_v7 = vshrl.u32 %v787_v25, %v326_v55 }
  0x4e   :  { %v146_v60 = vsel %vm136_vm3, %v143_v50, %v145_v57  ;;  %v150_v61 = vsel %vm136_vm3, %v147_v51, %v149_v58  ;;  %v158_v62 = vmul.u32 %v870_v20, %v142_v56  ;;  %v332_v10 = vshrl.u32 %v788_v27, %v326_v55 }
  0x4f   :  { %v885_v0 = vmul.u32.u64.low %v870_v20, %v150_v61  ;;  %v886_v2 = vmul.u32.u64.high %v870_v20, %v150_v61, %v885_v0  ;;  %v889_v4 = vmul.u32.u64.low %v870_v20, %v146_v60  ;;  %v890_v6 = vmul.u32.u64.high %v870_v20, %v146_v60, %v889_v4 }
  0x50   :  { %v334_v11 = vshll.u32 %v788_v27, %v325_v47  ;;  %v335_v12 = vshrl.u32 %v789_v29, %v326_v55  ;;  %v337_v13 = vshll.u32 %v789_v29, %v325_v47  ;;  %v338_v14 = vshrl.u32 %v790_v31, %v326_v55 }
  0x51   :  { %v340_v16 = vshll.u32 %v790_v31, %v325_v47  ;;  %v330_v17 = vor.u32 %v329_v7, %v328_v59  ;;  %v333_v18 = vor.u32 %v332_v10, %v331_v9  ;;  %v341_v19 = vshrl.u32 %v791_v38, %v326_v55 }
  0x52   :  { %vm343_vm6 = vcmp.lt.s32.totalorder %v324_v46, 1  ;;  %vm160_vm7 = vc.u32 %v886_v2, %v889_v4  ;;  %v161_v22 = vadd.s32 1, %v890_v6  ;;  %v336_v23 = vor.u32 %v335_v12, %v334_v11 }
  0x53   :  { %v359_v20 = vshll.u32 %v319_v21, 8  ;;  %v339_v24 = vor.u32 %v338_v14, %v337_v13  ;;  %v342_v25 = vor.u32 %v341_v19, %v340_v16  ;;  %vm344_vm8 = vcmp.lt.s32.totalorder %v324_v46, 2 }
  0x54   :  { %vm345_vm9 = vcmp.lt.s32.totalorder %v324_v46, 3  ;;  %v162_v26 = vsel %vm160_vm7, %v161_v22, %v890_v6  ;;  %vm346_vm10 = vcmp.lt.s32.totalorder %v324_v46, 4  ;;  %v347_v27 = vsel %vm343_vm6, %v327_v63, %v330_v17 }
  0x55   :  { %v351_v28 = vsel %vm343_vm6, %v330_v17, %v333_v18  ;;  %v163_v29 = vadd.s32 %v162_v26, %v158_v62  ;;  %v348_v30 = vsel %vm346_vm10, %v336_v23, 2102212464  ;;  %v352_v31 = vsel %vm346_vm10, %v339_v24, 920167782 }
  0x56   :  { %v355_v32 = vsel %vm343_vm6, %v333_v18, %v336_v23  ;;  %v349_v33 = vsel %vm345_vm9, %v333_v18, %v348_v30  ;;  %v353_v34 = vsel %vm345_vm9, %v336_v23, %v352_v31  ;;  %v356_v15 = vsel %vm346_vm10, %v342_v25, 1326507024 }
  0x57   :  { %v164_v21 = vadd.s32 536870912, %v163_v29  ;;  %v354_v35 = vsel %vm344_vm8, %v351_v28, %v353_v34  ;;  %v357_v36 = vsel %vm345_vm9, %v339_v24, %v356_v15  ;;  %v350_v37 = vsel %vm344_vm8, %v347_v27, %v349_v33  ;;  %v80_v33 = vld [vmem:[#allocation3 + $0x18] sm:$0xff] }
  0x58   :  { %v358_v38 = vsel %vm344_vm8, %v355_v32, %v357_v36  ;;  %v903_v39 = vmul.u32.u64.low %v359_v20, %v354_v35  ;;  %v904_v40 = vmul.u32.u64.high %v359_v20, %v354_v35, %v903_v39  ;;  %v366_v45 = vmul.u32 %v359_v20, %v350_v37  ;;  %v77_v32 = vld [vmem:[#allocation3 + $0x10] sm:$0xff] }
  0x59   :  { %v165_v41 = vshrl.u32 %v164_v21, 30  ;;  %v906_v42 = vmul.u32.u64.low %v359_v20, %v358_v38  ;;  %v907_v43 = vmul.u32.u64.high %v359_v20, %v358_v38, %v906_v42  ;;  %v159_v57 = vadd.s32 %v889_v4, %v886_v2  ;;  %v88_v21 = vld [vmem:[#allocation6 + $0x10] sm:$0xff] }
  0x5a   :  { %v369_v47 = vadd.s32 1, %v904_v40  ;;  %v94_v37 = vmul.f32 %v77_v32, %v77_v32  ;;  %v96_v38 = vmul.f32 %v80_v33, %v80_v33  ;;  %vm195_vm7 = vweird.f32 %v856_v1 }
  0x5b   :  { %v166_v44 = vshll.u32 %v165_v41, 30  ;;  %vm368_vm11 = vc.u32 %v907_v43, %v903_v39  ;;  %v189_v17 = vsub.s32 4, %v165_v41  ;;  %v367_v2 = vadd.s32 %v903_v39, %v907_v43 }
  0x5c   :  { %v370_v49 = vsel %vm368_vm11, %v369_v47, %v904_v40  ;;  %v98_v39 = vmul.f32 %v88_v21, %v88_v21  ;;  %v95_v47 = vmul.f32 0.083333336, %v94_v37  ;;  %vm403_vm9 = vweird.f32 %v860_v5 }
  0x5d   :  { %v167_v48 = vsub.s32 %v163_v29, %v166_v44  ;;  %v371_v51 = vadd.s32 %v370_v49, %v366_v45  ;;  %v190_v24 = vsel %vm105_vm14, %v189_v17, %v165_v41  ;;  %v90_v41 = vld [vmem:[#allocation6 + $0x18] sm:$0xff] }
  0x5e   :  { %v192_v31 = vsel %vm104_vm15, 0, %v190_v24  ;;  %v99_v49 = vmul.f32 0.083333336, %v98_v39 }
  0x5f   :  { %v169_v50 = vsub.s32 0, %v167_v48  ;;  %v372_v52 = vadd.s32 536870912, %v371_v51  ;;  %v299_v35 = vadd.s32 3, %v192_v31  ;;  %v196_v42 = vand.u32 3, %v192_v31 }
  0x61   :  { %v632_v46 = vmin.u32 %v169_v50, %v167_v48  ;;  %v373_v54 = vshrl.u32 %v372_v52, 30  ;;  %v300_v43 = vand.u32 3, %v299_v35  ;;  %v100_v50 = vmul.f32 %v90_v41, %v90_v41 }
  0x62   :  { %vm198_vm2 = vcmp.eq.s32.totalorder %v196_v42, 0  ;;  %vm201_vm3 = vcmp.eq.s32.totalorder %v196_v42, 2  ;;  %vm197_vm6 = vcmp.lt.s32.totalorder %v196_v42, 2 }
  0x63   :  { %v171_v53 = vclz %v632_v46  ;;  %v374_v56 = vshll.u32 %v373_v54, 30  ;;  %v397_v3 = vsub.s32 4, %v373_v54  ;;  %vm302_vm4 = vcmp.eq.s32.totalorder %v300_v43, 0 }
  0x64   :  { %vm305_vm5 = vcmp.eq.s32.totalorder %v300_v43, 2  ;;  %vm301_vm8 = vcmp.lt.s32.totalorder %v300_v43, 2 }
  0x65   :  { %v633_v55 = vadd.s32 4294967294, %v171_v53  ;;  %v375_v59 = vsub.s32 %v371_v51, %v374_v56  ;;  %v398_v45 = vsel %vm313_vm0, %v397_v3, %v373_v54 }
  0x66   :  { %v400_v53 = vsel %vm312_vm1, 0, %v398_v45 }
  0x67   :  { %vm634_vm12 = vcmp.lt.s32.totalorder %v633_v55, 0  ;;  %v377_v63 = vsub.s32 0, %v375_v59 }
  0x68   :  { %v174_v58 = vsel %vm634_vm12, 0, %v633_v55 }
  0x69   :  { %v175_v60 = vsub.s32 32, %v174_v58  ;;  %v176_v61 = vshll.u32 %v167_v48, %v174_v58  ;;  %v179_v62 = vsub.s32 4294967266, %v174_v58  ;;  %v640_v7 = vmin.u32 %v377_v63, %v375_v59 }
  0x6a   :  { %v97_v48 = vmul.f32 0.083333336, %v96_v38 }
  0x6b   :  { %v177_v0 = vshrl.u32 %v159_v57, %v175_v60  ;;  %v180_v6 = vadd.s32 127, %v179_v62  ;;  %v379_v11 = vclz %v640_v7  ;;  %v101_v57 = vmul.f32 0.083333336, %v100_v50  ;;  %v84_v50 = vld [vmem:[#allocation6] sm:$0xff] }
  0x6c   :  { %v520_v54 = vsub.f32 %v95_v47, %v97_v48 }
  0x6d   :  { %v178_v9 = vor.u32 %v177_v0, %v176_v61  ;;  %v181_v10 = vshll.u32 %v180_v6, 23  ;;  %v641_v14 = vadd.s32 4294967294, %v379_v11  ;;  %v518_v0 = vadd.f32 %v97_v48, %v95_v47  ;;  %v71_v47 = vld [vmem:[#allocation3] sm:$0xff] }
  0x6e   :  { %v521_v6 = vmul.f32 0.5, %v520_v54 }
  0x6f   :  { %v182_v12 = vor.u32 4788187, %v181_v10  ;;  %v185_v13 = vcvt.s32.f32 %v178_v9  ;;  %vm642_vm13 = vcmp.lt.s32.totalorder %v641_v14, 0  ;;  %v404_v10 = vand.u32 3, %v400_v53 }
  0x70   :  { %v382_v18 = vsel %vm642_vm13, 0, %v641_v14  ;;  %v519_v14 = vmul.f32 0.5, %v518_v0 }
  0x71   :  { %v183_v16 = vand.u32 2147483647, %v182_v12  ;;  %v383_v19 = vsub.s32 32, %v382_v18  ;;  %v384_v22 = vshll.u32 %v375_v59, %v382_v18  ;;  %v387_v23 = vsub.s32 4294967266, %v382_v18 }
  0x72   :  { %v507_v59 = vadd.s32 3, %v400_v53  ;;  %v524_v12 = vsub.f32 %v99_v49, %v101_v57  ;;  %vm409_vm10 = vcmp.eq.s32.totalorder %v404_v10, 2  ;;  %vm406_vm12 = vcmp.eq.s32.totalorder %v404_v10, 0 }
  0x73   :  { %v186_v4 = vmul.f32 %v185_v13, %v183_v16  ;;  %v385_v25 = vshrl.u32 %v367_v2, %v383_v19  ;;  %v388_v26 = vadd.s32 127, %v387_v23 }
  0x74   :  { %v508_v11 = vand.u32 3, %v507_v59  ;;  %v525_v18 = vmul.f32 0.5, %v524_v12 }
  0x75   :  { %v187_v20 = vxor.u32 2147483648, %v186_v4  ;;  %v386_v29 = vor.u32 %v385_v25, %v384_v22  ;;  %v389_v30 = vshll.u32 %v388_v26, 23 }
  0x76   :  { %vm513_vm11 = vcmp.eq.s32.totalorder %v508_v11, 2  ;;  %vm510_vm13 = vcmp.eq.s32.totalorder %v508_v11, 0 }
  0x77   :  { %v188_v27 = vsel %vm105_vm14, %v187_v20, %v186_v4  ;;  %v390_v34 = vor.u32 4788187, %v389_v30  ;;  %v393_v15 = vcvt.s32.f32 %v386_v29  ;;  %vm405_vm14 = vcmp.lt.s32.totalorder %v404_v10, 2 }
  0x78   :  { %v191_v28 = vsel %vm104_vm15, %v856_v1, %v188_v27  ;;  %v522_v1 = vadd.f32 %v101_v57, %v99_v49  ;;  %vm509_vm15 = vcmp.lt.s32.totalorder %v508_v11, 2  ;;  %v74_v49 = vld [vmem:[#allocation3 + $0x8] sm:$0xff] }
  0x79   :  { %667 = vcosq.f32 %v191_v28  ;;  %v391_v36 = vand.u32 2147483647, %v390_v34 }
  0x7a   :  { %669 = vsinq.f32 %v191_v28  ;;  %v523_v30 = vmul.f32 0.5, %v522_v1 }
  0x7b   :  { %v394_v40 = vmul.f32 %v393_v15, %v391_v36 }
  0x7d   :  { %v395_v44 = vxor.u32 2147483648, %v394_v40 }
  0x7f   :  { %v396_v51 = vsel %vm313_vm0, %v395_v44, %v394_v40 }
  0x80   :  { %v399_v52 = vsel %vm312_vm1, %v860_v5, %v396_v51  ;;  %v86_v51 = vld [vmem:[#allocation6 + $0x8] sm:$0xff] }
  0x81   :  { %671 = vcosq.f32 %v399_v52 }
  0x82   :  { %673 = vsinq.f32 %v399_v52 }
  0x83   :  { %v668_v46 = vpop.eup %667 }
  0x84   :  { %v670_v55 = vpop.eup %669  ;;  %v202_v56 = vxor.u32 2147483648, %v668_v46 }
  0x85   :  { %v199_v8 = vxor.u32 2147483648, %v670_v55 }
  0x86   :  { %v203_v58 = vsel %vm201_vm3, %v202_v56, %v670_v55  ;;  %v307_v62 = vsel %vm305_vm5, %v202_v56, %v670_v55  ;;  %v537_v56 = vsub.f32 %v71_v47, %v84_v50 }
  0x87   :  { %v200_v60 = vsel %vm198_vm2, %v668_v46, %v199_v8  ;;  %v304_v61 = vsel %vm302_vm4, %v668_v46, %v199_v8  ;;  %v538_v8 = vsub.f32 %v74_v49, %v86_v51 }
  0x88   :  { %v204_v63 = vsel %vm197_vm6, %v200_v60, %v203_v58  ;;  %v308_v9 = vsel %vm301_vm8, %v304_v61, %v307_v62  ;;  %v539_v58 = vmul.f32 %v537_v56, %v537_v56 }
  0x89   :  { %v205_v7 = vsel %vm195_vm7, nan, %v204_v63  ;;  %v309_v13 = vsel %vm195_vm7, nan, %v308_v9  ;;  %v540_v59 = vmul.f32 %v538_v8, %v538_v8  ;;  %v541_v61 = vmul.f32 %v538_v8, %v537_v56 }
  0x8a   :  { %v526_v16 = vmul.f32 %v521_v6, %v205_v7  ;;  %v529_v22 = vmul.f32 %v521_v6, %v309_v13 }
  0x8b   :  { %v672_v17 = vpop.eup %671 }
  0x8c   :  { %v674_v2 = vpop.eup %673  ;;  %v410_v4 = vxor.u32 2147483648, %v672_v17  ;;  %v527_v24 = vadd.f32 %v526_v16, %v519_v14  ;;  %v528_v25 = vsub.f32 %v519_v14, %v526_v16  ;;  %v546_v21 = vmul.f32 %v529_v22, %v529_v22 }
  0x8d   :  { %v407_v19 = vxor.u32 2147483648, %v674_v2 }
  0x8e   :  { %v411_v23 = vsel %vm409_vm10, %v410_v4, %v674_v2  ;;  %v515_v20 = vsel %vm513_vm11, %v410_v4, %v674_v2  ;;  %v545_v15 = vmul.f32 %v528_v25, %v527_v24 }
  0x8f   :  { %v408_v26 = vsel %vm406_vm12, %v672_v17, %v407_v19  ;;  %v512_v27 = vsel %vm510_vm13, %v672_v17, %v407_v19 }
  0x90   :  { %v412_v28 = vsel %vm405_vm14, %v408_v26, %v411_v23  ;;  %v516_v29 = vsel %vm509_vm15, %v512_v27, %v515_v20  ;;  %v547_v37 = vsub.f32 %v545_v15, %v546_v21 }
  0x91   :  { %v413_v31 = vsel %vm403_vm9, nan, %v412_v28  ;;  %v517_v32 = vsel %vm403_vm9, nan, %v516_v29  ;;  %v93_v28 = vld [vmem:[#allocation8] sm:$0xff] }
  0x92   :  { %v530_v33 = vmul.f32 %v525_v18, %v413_v31  ;;  %v533_v34 = vmul.f32 %v525_v18, %v517_v32 }
  0x94   :  { %v531_v35 = vadd.f32 %v530_v33, %v523_v30  ;;  %v532_v36 = vsub.f32 %v523_v30, %v530_v33  ;;  %v549_v3 = vmul.f32 %v533_v34, %v533_v34  ;;  %v536_v55 = vadd.f32 %v533_v34, %v529_v22 }
  0x96   :  { %v548_v38 = vmul.f32 %v532_v36, %v531_v35  ;;  %v534_v52 = vadd.f32 %v531_v35, %v527_v24  ;;  %v535_v53 = vadd.f32 %v532_v36, %v528_v25  ;;  %v543_v57 = vmul.f32 %v536_v55, %v536_v55 }
  0x97   :  { %v556_v9 = vmul.f32 %v541_v61, %v536_v55 }
  0x98   :  { %v550_v39 = vsub.f32 %v548_v38, %v549_v3  ;;  %v542_v54 = vmul.f32 %v535_v53, %v534_v52  ;;  %v552_v62 = vmul.f32 %v540_v59, %v534_v52  ;;  %v553_v63 = vmul.f32 %v539_v58, %v535_v53 }
  0x99   :  { %v557_v11 = vmul.f32 0.5, %v556_v9 }
  0x9a   :  { %v551_v40 = vmul.f32 %v550_v39, %v547_v37  ;;  %v544_v60 = vsub.f32 %v542_v54, %v543_v57  ;;  %v554_v7 = vadd.f32 %v553_v63, %v552_v62 }
  0x9c   :  { %v559_v41 = vmax.f32 %v551_v40, 0.0  ;;  %v555_v10 = vmul.f32 0.25, %v554_v7 }
  0x9e   :  { %675 = vrsqrt.f32 %v559_v41  ;;  %vm562_vm0 = vcmp.eq.f32.partialorder %v559_v41, inf  ;;  %v565_v43 = vand.u32 2147483648, %v559_v41  ;;  %vm564_vm1 = vcmp.eq.f32.partialorder %v559_v41, 0.0 }
  0x9f   :  { %v558_v12 = vsub.f32 %v555_v10, %v557_v11 }
  0xa8   :  { %v676_v42 = vpop.eup %675 }
  0xa9   :  { %v561_v44 = vmul.f32 %v676_v42, %v559_v41 }
  0xab   :  { %v563_v5 = vsel %vm562_vm0, %v559_v41, %v561_v44 }
  0xac   :  { %v566_v45 = vsel %vm564_vm1, %v565_v43, %v563_v5 }
  0xad   :  { %v567_v48 = vmul.f32 4.0, %v566_v45 }
  0xaf   :  { %v568_v46 = vadd.f32 0.001, %v567_v48 }
  0xb1   :  { %677 = vrcp.f32 %v568_v46 }
  0xb2   :  { %679 = vrcp.f32 %v544_v60 }
  0xbb   :  { %v678_v0 = vpop.eup %677 }
  0xbc   :  { %v570_v6 = vmul.f32 %v678_v0, %v544_v60  ;;  %v680_v13 = vpop.eup %679 }
  0xbd   :  { %v575_v17 = vmul.f32 %v680_v13, %v558_v12 }
  0xbe   :  { %681 = vlog2.f32 %v570_v6 }
  0xc8   :  { %v682_v14 = vpop.eup %681 }
  0xc9   :  { %v572_v16 = vmul.f32 0.6931472, %v682_v14 }
  0xcb   :  { %v573_v1 = vmul.f32 0.5, %v572_v16 }
  0xcd   :  { %v576_v2 = vadd.f32 %v575_v17, %v573_v1 }
  0xcf   :  { %v577_v4 = vmax.f32 %v576_v2, 0.001 }
  0xd1   :  { %v578_v18 = vmin.f32 %v577_v4, 100.0 }
  0xd3   :  { %v579_v19 = vsub.f32 0.0, %v578_v18 }
  0xd5   :  { %v580_v22 = vmul.f32 1.442695, %v579_v19 }
  0xd7   :  { %683 = vpow2.f32 %v580_v22 }
  0xe1   :  { %v684_v23 = vpop.eup %683 }
  0xe2   :  { %v582_v20 = vsub.f32 1.0, %v684_v23 }
  0xe4   :  { %v583_v24 = vadd.f32 0.001, %v582_v20 }
  0xe6   :  { %685 = vrsqrt.f32 %v583_v24  ;;  %vm586_vm2 = vcmp.eq.f32.partialorder %v583_v24, inf  ;;  %v589_v26 = vand.u32 2147483648, %v583_v24  ;;  %vm588_vm3 = vcmp.eq.f32.partialorder %v583_v24, 0.0 }
  0xf0   :  { %v686_v25 = vpop.eup %685 }
  0xf1   :  { %v585_v27 = vmul.f32 %v686_v25, %v583_v24 }
  0xf3   :  { %v587_v29 = vsel %vm586_vm2, %v583_v24, %v585_v27 }
  0xf4   :  { %v590_v30 = vsel %vm588_vm3, %v589_v26, %v587_v29 }
  0xf5   :  { %v591_v31 = vmul.f32 %v590_v30, %v93_v28 }
  0xf7   :  { %v600_v32 = vrot.slane %v591_v31, 4 }
  0xf9   :  { %v601_v33 = vadd.f32 %v600_v32, %v591_v31 }
  0xfb   :  { %v602_v34 = vrot.slane %v601_v33, 2 }
  0xfd   :  { %v603_v15 = vadd.f32 %v602_v34, %v601_v33 }
  0xff   :  { %v604_v21 = vrot.slane %v603_v15, 1 }
 0x101   :  { %v605_v35 = vadd.f32 %v604_v21, %v603_v15 }
 0x103   :  { %606 = vst [vmem:[#allocation9] sm:$0x1] %v605_v35 }
 0x104   :  { %764 = shalt.err (!%p761_p0)
}
 0x105   :  { %s765_s26 = scalar_lea.hbm %s944_s3, 16 }
 0x106   :  { %p766_p1 = scmp.ne.s32.totalorder %s944_s3, %s765_s26  ;;  %p769_p2 = scmp.lt.u32.totalorder %s765_s26, %s944_s3 }
 0x108   :  { %p771_p3 = pnand %p769_p2, %p766_p1 }
 0x10a   :  { %774 = shalt.err (!%p771_p3)
}
 0x10b   :  { %616 = dma.vmem_to_hbm [thread:$0]  %s614_s21, 16, %s944_s3, [#allocation5]  }
 0x10c   :  { %779 = dma.done.wait [#allocation5], 16  }
 0x10d   :  { %780 = vsyncadd [#allocation5], 4294967280 }
 0x10e   :  { %620 = vsyncpa [#allocation4], 1 }
 0x10f   :  { %621 = vsyncpa [#allocation7], 1 }
 0x110   :  { %622 = vsyncpa [#allocation5], 1 }

</bundles_post_ra>
